<compile_context>
chip_gen: v5e
topology: v5e:2x2
jax: 0.10.0
libtpu: 0.0.40
codegen_flags: <defaults>
</compile_context>

<pallas_src>
import jax
import jax.numpy as jnp
from jax import lax
from jax.experimental import pallas as pl
from jax.experimental.pallas import tpu as pltpu

EPS = 1e-5


def _stats_kernel(x_ref, colsum_ref, gram_ref):
    """Pass 1: accumulate per-channel column-sum and Gram matrix of relu(x_cat)."""
    @pl.when(pl.program_id(0) == 0)
    def _():
        colsum_ref[...] = jnp.zeros_like(colsum_ref)
        gram_ref[...] = jnp.zeros_like(gram_ref)

    xr = jnp.maximum(x_ref[...], 0.0)                       # ReLU (commutes w/ sampling)
    colsum_ref[...] += jnp.sum(xr, axis=0, keepdims=True)   # (1, 2*C_in)
    # X^T X on the MXU (contraction over the M-tile rows).
    gram_ref[...] += lax.dot_general(
        xr, xr, dimension_numbers=(((0,), (0,)), ((), ())),
        preferred_element_type=jnp.float32)


def _output_kernel(x_ref, w_ref, scale_ref, bias_ref, o_ref):
    """Pass 2: y = relu(x_cat) @ W_blockdiag, then fused BN as one FMA per element."""
    xr = jnp.maximum(x_ref[...], 0.0)
    y = jnp.dot(xr, w_ref[...], preferred_element_type=jnp.float32)
    o_ref[...] = y * scale_ref[...] + bias_ref[...]


def factorized_reduce(x, w1, w2, gamma, beta, *, block_m=1024):
    """x: (N, C_in, H, W) f32 NCHW. w1, w2: (C_out//2, C_in). gamma, beta: (C_out,)."""
    N, C_in, H, W = x.shape
    C_half = w1.shape[0]
    C_out = 2 * C_half
    # TODO(synk): odd H/W needs the zero-padded tail row/col PyTorch's F.pad adds for path2.
    assert H % 2 == 0 and W % 2 == 0
    Ho, Wo = H // 2, W // 2
    M = N * Ho * Wo
    C2 = 2 * C_in

    # ---- layout glue (single fused XLA gather pass over x): stride-2 even/even and
    # odd/odd sampling, channel-concat of the two paths, NCHW -> flattened-NHWC rows.
    # TODO(synk): pull the stride-2 sampling into the kernel (strided pl.ds on NHWC x)
    #             to make the kernel the only pass over x.
    xe = x[:, :, 0::2, 0::2]                               # (N, C_in, Ho, Wo)
    xo = x[:, :, 1::2, 1::2]
    x_cat = jnp.concatenate([xe, xo], axis=1)              # (N, 2*C_in, Ho, Wo)
    x_cat = x_cat.transpose(0, 2, 3, 1).reshape(M, C2)     # (M, 2*C_in)

    # Block-diagonal weight: one matmul yields the already-concatenated (M, C_out) output.
    w_bd = jnp.zeros((C2, C_out), dtype=jnp.float32)
    w_bd = w_bd.at[:C_in, :C_half].set(w1.T)
    w_bd = w_bd.at[C_in:, C_half:].set(w2.T)

    # Tile M; pad to a multiple of the tile with zero rows (inert for stats/output).
    block_m = min(block_m, M)
    block_m = max(8, ((block_m + 7) // 8) * 8)
    num_tiles = pl.cdiv(M, block_m)
    M_pad = num_tiles * block_m
    if M_pad != M:
        x_cat = jnp.pad(x_cat, ((0, M_pad - M), (0, 0)))

    # ---- pass 1: global BN statistics (column-sum + Gram), accumulated across tiles.
    colsum, gram = pl.pallas_call(
        _stats_kernel,
        out_shape=(jax.ShapeDtypeStruct((1, C2), jnp.float32),
                   jax.ShapeDtypeStruct((C2, C2), jnp.float32)),
        grid=(num_tiles,),
        in_specs=[pl.BlockSpec((block_m, C2), lambda i: (i, 0))],
        out_specs=(pl.BlockSpec((1, C2), lambda i: (0, 0)),
                   pl.BlockSpec((C2, C2), lambda i: (0, 0))),
        compiler_params=pltpu.CompilerParams(
            dimension_semantics=("arbitrary",)),
    )(x_cat)

    # Tiny per-channel math (C_out elements) in plain JAX; folds BN into scale/bias.
    sum_y = (colsum @ w_bd)[0]                              # (C_out,)
    mean = sum_y / M
    sumsq_y = jnp.sum(w_bd * (gram @ w_bd), axis=0)         # diag(W^T G W)
    var = jnp.maximum(sumsq_y / M - mean * mean, 0.0)       # biased (training-mode BN)
    scale = (gamma * lax.rsqrt(var + EPS)).reshape(1, C_out).astype(jnp.float32)
    bias = (beta - mean * gamma * lax.rsqrt(var + EPS)).reshape(1, C_out).astype(jnp.float32)

    # ---- pass 2: recompute y per tile, apply folded BN, write the output exactly once.
    out_flat = pl.pallas_call(
        _output_kernel,
        out_shape=jax.ShapeDtypeStruct((M_pad, C_out), jnp.float32),
        grid=(num_tiles,),
        in_specs=[pl.BlockSpec((block_m, C2), lambda i: (i, 0)),
                  pl.BlockSpec((C2, C_out), lambda i: (0, 0)),
                  pl.BlockSpec((1, C_out), lambda i: (0, 0)),
                  pl.BlockSpec((1, C_out), lambda i: (0, 0))],
        out_specs=pl.BlockSpec((block_m, C_out), lambda i: (i, 0)),
        compiler_params=pltpu.CompilerParams(
            dimension_semantics=("parallel",)),
    )(x_cat, w_bd, scale, bias)

    out = out_flat[:M].reshape(N, Ho, Wo, C_out).transpose(0, 3, 1, 2)  # back to NCHW
    return out


def reference(x, w1, w2, gamma, beta):
    """Pure-JAX reference mirroring the PyTorch forward (training-mode BN)."""
    xr = jnp.maximum(x, 0.0)
    p1 = jnp.einsum('nchw,oc->nohw', xr[:, :, 0::2, 0::2], w1)
    p2 = jnp.einsum('nchw,oc->nohw', xr[:, :, 1::2, 1::2], w2)
    y = jnp.concatenate([p1, p2], axis=1)
    mean = y.mean(axis=(0, 2, 3), keepdims=True)
    var = ((y - mean) ** 2).mean(axis=(0, 2, 3), keepdims=True)
    return ((y - mean) / jnp.sqrt(var + EPS) * gamma.reshape(1, -1, 1, 1)
            + beta.reshape(1, -1, 1, 1))


if __name__ == "__main__":
    N, C_in, C_out, H, W = 2, 4, 8, 16, 16
    C_half = C_out // 2

    key = jax.random.PRNGKey(0)
    kx, k1, k2 = jax.random.split(key, 3)
    x = jax.random.normal(kx, (N, C_in, H, W), dtype=jnp.float32)
    # Conv2d weights (C_out//2, C_in, 1, 1) -> kernel dims squeezed.
    w1 = 0.1 * jax.random.normal(k1, (C_half, C_in), dtype=jnp.float32)
    w2 = 0.1 * jax.random.normal(k2, (C_half, C_in), dtype=jnp.float32)
    # BatchNorm2d(affine=True) default init: weight=1, bias=0.
    gamma = jnp.ones((C_out,), dtype=jnp.float32)
    beta = jnp.zeros((C_out,), dtype=jnp.float32)

    # block_m=64 so the toy shape (M = 2*8*8 = 128) exercises a 2-step grid per pass.
    out = factorized_reduce(x, w1, w2, gamma, beta, block_m=64)
    out = jax.block_until_ready(out)

    ref = reference(x, w1, w2, gamma, beta)
    assert out.shape == (N, C_out, H // 2, W // 2)
    assert jnp.allclose(out, ref, rtol=1e-4, atol=1e-4)

    print("KERNEL_OK")
</pallas_src>

<mosaic_0001>
module attributes {stable_mosaic.version = 11 : i64} {
  func.func @_stats_kernel(%arg0: i32, %arg1: memref<64x8xf32, #tpu.memory_space<vmem>>, %arg2: memref<1x8xf32, #tpu.memory_space<vmem>>, %arg3: memref<8x8xf32, #tpu.memory_space<vmem>>) attributes {dimension_semantics = [#tpu.dimension_semantics<arbitrary>], iteration_bounds = array<i64: 2>, scalar_prefetch = 0 : i64, scratch_operands = 0 : i64, tpu.core_type = #tpu.core_type<tc>, window_params = [{transform_indices = @transform_0, window_bounds = array<i64: 64, 8>}, {pipeline_mode = #tpu.pipeline_mode<synchronous>, transform_indices = @transform_1, window_bounds = array<i64: 1, 8>}, {pipeline_mode = #tpu.pipeline_mode<synchronous>, transform_indices = @transform_2, window_bounds = array<i64: 8, 8>}]} {
    %c0_i32 = arith.constant 0 : i32
    %0 = arith.cmpi eq, %arg0, %c0_i32 : i32
    %1 = arith.extui %0 : i1 to i32
    %c0_i32_0 = arith.constant 0 : i32
    %2 = arith.cmpi ne, %1, %c0_i32_0 : i32
    scf.if %2 {
      %cst_12 = arith.constant 0.000000e+00 : f32
      %15 = vector.broadcast %cst_12 : f32 to vector<1x8xf32>
      %c0_13 = arith.constant 0 : index
      %c0_14 = arith.constant 0 : index
      %16 = vector.load %arg2[%c0_13, %c0_14] : memref<1x8xf32, #tpu.memory_space<vmem>>, vector<1x8xf32>
      tpu.vector_store %arg2[%c0_13, %c0_14], %15 {strides = array<i32>} : memref<1x8xf32, #tpu.memory_space<vmem>>, vector<1x8xf32>,
      %cst_15 = arith.constant 0.000000e+00 : f32
      %17 = vector.broadcast %cst_15 : f32 to vector<8x8xf32>
      %c0_16 = arith.constant 0 : index
      %c0_17 = arith.constant 0 : index
      %18 = vector.load %arg3[%c0_16, %c0_17] : memref<8x8xf32, #tpu.memory_space<vmem>>, vector<8x8xf32>
      tpu.vector_store %arg3[%c0_16, %c0_17], %17 {strides = array<i32>} : memref<8x8xf32, #tpu.memory_space<vmem>>, vector<8x8xf32>,
    } else {
    }
    %c0 = arith.constant 0 : index
    %c0_1 = arith.constant 0 : index
    %3 = vector.load %arg1[%c0, %c0_1] : memref<64x8xf32, #tpu.memory_space<vmem>>, vector<64x8xf32>
    %cst = arith.constant 0.000000e+00 : f32
    %4 = vector.broadcast %cst : f32 to vector<64x8xf32>
    %5 = arith.maximumf %3, %4 : vector<64x8xf32>
    %c0_2 = arith.constant 0 : index
    %c0_3 = arith.constant 0 : index
    %6 = vector.load %arg2[%c0_2, %c0_3] : memref<1x8xf32, #tpu.memory_space<vmem>>, vector<1x8xf32>
    %cst_4 = arith.constant dense<0.000000e+00> : vector<8xf32>
    %7 = vector.multi_reduction <add>, %5, %cst_4 [0] : vector<64x8xf32> to vector<8xf32>
    %8 = vector.shape_cast %7 : vector<8xf32> to vector<1x8xf32>
    %9 = arith.addf %6, %8 : vector<1x8xf32>
    %c0_5 = arith.constant 0 : index
    %c0_6 = arith.constant 0 : index
    %10 = vector.load %arg2[%c0_5, %c0_6] : memref<1x8xf32, #tpu.memory_space<vmem>>, vector<1x8xf32>
    tpu.vector_store %arg2[%c0_5, %c0_6], %9 {strides = array<i32>} : memref<1x8xf32, #tpu.memory_space<vmem>>, vector<1x8xf32>,
    %c0_7 = arith.constant 0 : index
    %c0_8 = arith.constant 0 : index
    %11 = vector.load %arg3[%c0_7, %c0_8] : memref<8x8xf32, #tpu.memory_space<vmem>>, vector<8x8xf32>
    %cst_9 = arith.constant dense<0.000000e+00> : vector<8x8xf32>
    %12 = tpu.matmul %5, %5, %cst_9 {dimension_numbers = #tpu.dot_dimension_numbers<[0], [0], [1], [1], [0, 1, 1, 1], [], []>} : vector<64x8xf32>, vector<64x8xf32>, vector<8x8xf32> -> vector<8x8xf32>
    %13 = arith.addf %11, %12 : vector<8x8xf32>
    %c0_10 = arith.constant 0 : index
    %c0_11 = arith.constant 0 : index
    %14 = vector.load %arg3[%c0_10, %c0_11] : memref<8x8xf32, #tpu.memory_space<vmem>>, vector<8x8xf32>
    tpu.vector_store %arg3[%c0_10, %c0_11], %13 {strides = array<i32>} : memref<8x8xf32, #tpu.memory_space<vmem>>, vector<8x8xf32>,
    return
  }
  func.func @transform_0(%arg0: i32) -> (i32, i32) {
    %c0_i32 = arith.constant 0 : i32
    %c0_i32_0 = arith.constant 0 : i32
    return %arg0, %c0_i32 : i32, i32
  }
  func.func @transform_1(%arg0: i32) -> (i32, i32) {
    %c0_i32 = arith.constant 0 : i32
    %c0_i32_0 = arith.constant 0 : i32
    %c0_i32_1 = arith.constant 0 : i32
    return %c0_i32, %c0_i32_0 : i32, i32
  }
  func.func @transform_2(%arg0: i32) -> (i32, i32) {
    %c0_i32 = arith.constant 0 : i32
    %c0_i32_0 = arith.constant 0 : i32
    %c0_i32_1 = arith.constant 0 : i32
    return %c0_i32, %c0_i32_0 : i32, i32
  }
}

</mosaic_0001>

<bundles_post_ra>
// kernel: tpu_custom_call.1
= control target key start
LH: loop header
LB: loop body
LE: loop exit
PB: predicated region body
PF: predicated region fallthrough
CT: control target
= control target key end

     0   :  { %8 = vsyncpa [#allocation3], 0  ;;  %s496_s0 = inlined_call_operand.vmem [shape: f32[128,8], index: 0, kind: input, shape index: {}]   ;;  %s497_s1 = inlined_call_operand.hbm [shape: f32[1,8], index: 1, kind: output, shape index: {0}]   ;;  %s498_s2 = inlined_call_operand.hbm [shape: f32[8,8], index: 2, kind: output, shape index: {1}]  }
   0x1   :  { %9 = vsyncpa [#allocation5], 0  ;;  %s440_s9 = smov 0  }
   0x2 LB: > { %s446_s10 = sadd.s32 4294967295, %s420_s9   ;;  %p315_p0 = scmp.ge.s32.totalorder %s420_s9, 1  ;;  %s420_s9 = sphi %s440_s9, %s15_s9  }
   0x3   : > { %p108_p1 = scmp.lt.s32.totalorder %s420_s9, 3 }
   0x5   : > { %p109_p2 = pnand %p315_p0, %p108_p1 }
   0x6   : > { %s316_s11 = sshll.u32 (!%p109_p2), %s446_s10, 3  ;;  %p318_p4 = scmp.ne.s32.totalorder (!%p109_p2), %s446_s10, 0 }
   0x7   : > { %112 = sbr.rel (%p109_p2) target bundleno = 322 (0x142), region = 24  ;;  %p126_p3 = scmp.lt.s32.totalorder (!%p109_p2), %s316_s11, 15 }
   0xc   : > { %s500_s11 = smov (!%p126_p3, %s316_s11), 15  ;;  %134 = sbr.rel (%p318_p4) target bundleno = 20 (0x14), region = 28 }
   0xd   : > { %s317_s12 = sshll.u32 %s500_s11, 3 }
   0xe   : > { %s454_s15 = scalar_lea.vmem %s496_s0, %s317_s12 }
  0x11   : > { %vm135_vm0 = vcmask 57344   ;;  %vm137_vm1 = vcmask 64512   ;;  %v422_v0 = vmov 0.0  }
  0x12   : > { %136 = vst.msk [vmem:[#allocation2] sm:$0x1] %vm135_vm0, %v422_v0 }
  0x13   : > { %138 = vst.msk [vmem:[#allocation4] sm:$0xff] %vm137_vm1, %v422_v0 }
  0x14 PF: > { %v139_v1 = vld [vmem:[%s454_s15] sm:$0xff]  ;;  %vm156_vm2 = vcmask 64512   ;;  %v140_v2 = vld [vmem:[%s454_s15 + $0x8] sm:$0xff]  ;;  %v141_v3 = vld [vmem:[%s454_s15 + $0x10] sm:$0xff]  ;;  %vm214_vm3 = vcmask 523264   ;;  %s423_s16 = smov [#allocation2]  }
  0x15   : > { %v147_v4 = vmax.f32 %v139_v1, 0.0  ;;  %v148_v5 = vmax.f32 %v140_v2, 0.0  ;;  %v149_v6 = vmax.f32 %v141_v3, 0.0  ;;  %v142_v7 = vld [vmem:[%s454_s15 + $0x18] sm:$0xff]  ;;  %v143_v8 = vld [vmem:[%s454_s15 + $0x20] sm:$0xff]  ;;  %v144_v14 = vld [vmem:[%s454_s15 + $0x28] sm:$0xff] }
  0x16   : > { %v150_v12 = vmax.f32 %v142_v7, 0.0  ;;  %v151_v16 = vmax.f32 %v143_v8, 0.0  ;;  %v152_v19 = vmax.f32 %v144_v14, 0.0  ;;  %v145_v23 = vld [vmem:[%s454_s15 + $0x30] sm:$0xff]  ;;  %v146_v28 = vld [vmem:[%s454_s15 + $0x38] sm:$0xff]  ;;  %s246_s17 = sshll.u32 %s423_s16, 4  ;;  %s247_s17 = int_to_ptr.vmem [resolvable:$true] %s246_s17 }
  0x17   : > { %182 = vxpose.xlu0.b32.start [1/8] (short) (narrow) %v147_v4, 8  ;;  %v157_v9 = vsel %vm156_vm2, %v147_v4, 0.0  ;;  %v158_v10 = vsel %vm156_vm2, %v148_v5, 0.0  ;;  %v160_v11 = vsel %vm156_vm2, %v149_v6, 0.0  ;;  %v153_v25 = vmax.f32 %v145_v23, 0.0  ;;  %s248_s20 = sshll.u32 %s497_s1, 4  ;;  %s249_s20 = int_to_ptr.hbm [resolvable:$true] %s248_s20 }
  0x18   : > { %v159_v13 = vadd.f32 %v158_v10, %v157_v9  ;;  %v162_v15 = vsel %vm156_vm2, %v150_v12, 0.0  ;;  %v164_v18 = vsel %vm156_vm2, %v151_v16, 0.0  ;;  %v166_v21 = vsel %vm156_vm2, %v152_v19, 0.0  ;;  %p334_p5 = scmp.eq.s32.totalorder %s446_s10, 1  ;;  %s424_s21 = smov [#allocation4]  }
  0x19   : > { %v168_v26 = vsel %vm156_vm2, %v153_v25, 0.0  ;;  %v154_v29 = vmax.f32 %v146_v28, 0.0  ;;  %v155_v39 = vld [vmem:[#allocation2] sm:$0x1]  ;;  %vm179_vm4 = vcmask 57344   ;;  %s258_s22 = sshll.u32 %s424_s21, 4  ;;  %s259_s22 = int_to_ptr.vmem [resolvable:$true] %s258_s22 }
  0x1a   : > { %v161_v17 = vadd.f32 %v160_v11, %v159_v13  ;;  %v181_v41 = vld [vmem:[#allocation4] sm:$0xff]  ;;  %s260_s25 = sshll.u32 %s498_s2, 4  ;;  %s261_s25 = int_to_ptr.hbm [resolvable:$true] %s260_s25 }
  0x1b   : > { %226 = vmatpush.msra.mxu0 %v154_v29  ;;  %v170_v30 = vsel %vm156_vm2, %v154_v29, 0.0 }
  0x1c   : > { %v163_v20 = vadd.f32 %v162_v15, %v161_v17 }
  0x1d   : > { %227 = vmatpush.msra.mxu0 %v153_v25 }
  0x1e   : > { %v165_v22 = vadd.f32 %v164_v18, %v163_v20 }
  0x1f   : > { %183 = vxpose.xlu0.b32.cont [2/8] (short) (narrow) %v148_v5, 8  ;;  %228 = vmatpush.msra.mxu0 %v152_v19 }
  0x20   : > { %v167_v24 = vadd.f32 %v166_v21, %v165_v22 }
  0x21   : > { %229 = vmatpush.msra.mxu0 %v151_v16 }
  0x22   : > { %v169_v27 = vadd.f32 %v168_v26, %v167_v24 }
  0x23   : > { %230 = vmatpush.msra.mxu0 %v150_v12 }
  0x24   : > { %v171_v31 = vadd.f32 %v170_v30, %v169_v27 }
  0x25   : > { %231 = vmatpush.msra.mxu0 %v149_v6 }
  0x26   : > { %v172_v33 = vrot.slane %v171_v31, 4 }
  0x27   : > { %184 = vxpose.xlu0.b32.cont [3/8] (short) (narrow) %v149_v6, 8  ;;  %232 = vmatpush.msra.mxu0 %v148_v5 }
  0x28   : > { %v173_v34 = vadd.f32 %v172_v33, %v171_v31 }
  0x29   : > { %233 = vmatpush.msra.mxu0 %v147_v4 }
  0x2a   : > { %v174_v35 = vrot.slane %v173_v34, 2 }
  0x2c   : > { %v175_v36 = vadd.f32 %v174_v35, %v173_v34 }
  0x2e   : > { %v176_v37 = vrot.slane %v175_v36, 1 }
  0x2f   : > { %185 = vxpose.xlu0.b32.cont [4/8] (short) (narrow) %v150_v12, 8 }
  0x30   : > { %v177_v38 = vadd.f32 %v176_v37, %v175_v36 }
  0x32   : > { %v178_v40 = vadd.f32 %v177_v38, %v155_v39 }
  0x34   : > { %180 = vst.msk [vmem:[#allocation2] sm:$0x1] %vm179_vm4, %v178_v40 }
  0x35   : > { %327 = dma.vmem_to_hbm [thread:$0]  (%p334_p5), %s247_s17, 16, %s249_s20, [#allocation3]  }
  0x37   : > { %186 = vxpose.xlu0.b32.cont [5/8] (short) (narrow) %v151_v16, 8 }
  0x3f   : > { %187 = vxpose.xlu0.b32.cont [6/8] (short) (narrow) %v152_v19, 8 }
  0x47   : > { %188 = vxpose.xlu0.b32.cont [7/8] (short) (narrow) %v153_v25, 8 }
  0x4f   : > { %189 = vxpose.xlu0.b32.end [8/8] (short) (narrow) %v154_v29, 8 }
  0xbb   : > { %v198_v32 = vpop.trf.xlu0 }
  0xbc   : > { %319 = vmatmul.msk.f32.vlgmr.msra.gmra.mxu0 %vm214_vm3, %v198_v32 }
 0x139   : > { %v235_v42 = vpop.f32.mrf.mxu0 }
 0x13a   : > { %v238_v43 = vadd.f32 %v235_v42, %v181_v41 }
 0x13c   : > { %239 = vst.msk [vmem:[#allocation4] sm:$0xff] %vm156_vm2, %v238_v43 }
 0x13d   : > { %329 = dma.vmem_to_hbm [thread:$0]  (%p334_p5), %s259_s22, 128, %s261_s25, [#allocation5]  }
 0x13e   : > { %411 = dma.done.wait (%p334_p5), [#allocation3], 16  }
 0x13f   : > { %413 = vsyncadd (%p334_p5), [#allocation3], 4294967280 }
 0x140   : > { %415 = dma.done.wait (%p334_p5), [#allocation5], 128  }
 0x141   : > { %417 = vsyncadd (%p334_p5), [#allocation5], 4294967168 }
 0x142 PF: > { %s15_s9 = sadd.s32 1, %s420_s9  }
 0x143   : > { %p12_p6 = scmp.ge.s32.totalorder %s15_s9, 4  }
 0x145   :  { %14 = sbr.rel (!%p12_p6) target bundleno = 2 (0x2), region = 63 }
 0x14a   :  { %279 = vsyncpa [#allocation3], 1 }
 0x14b   :  { %281 = vsyncpa [#allocation3 + $0x1], 1 }
 0x14c   :  { %282 = vsyncpa [#allocation5], 1 }

</bundles_post_ra>
